<compile_context>
chip_gen: v6e
topology: v6e:2x2x1
jax: 0.10.0
libtpu: 0.0.40
codegen_flags: <defaults>
</compile_context>

<pallas_src>
import jax
import jax.numpy as jnp
from jax.experimental import pallas as pl
from jax.experimental.pallas import tpu as pltpu

_NEG = float(jnp.finfo(jnp.float32).min)


def _cdiv(a, b):
    return -(-a // b)


def _round_up(a, m):
    return _cdiv(a, m) * m


def _auto_config():
    """Per-generation defaults: (tile_bytes, vmem_limit_bytes, num_chunks)."""
    try:
        vmem = int(pltpu.get_tpu_info().vmem_capacity_bytes)
    except Exception:
        vmem = 64 * 1024 * 1024  # be conservative (v7x-class)
    if vmem >= 96 * 1024 * 1024:
        # v5e / v6e: 128 MiB VMEM, single TensorCore -> big tiles, one chunk.
        return 12 * 1024 * 1024, 80 * 1024 * 1024, 1
    # v7x-class: 64 MiB VMEM per TC, two TCs -> moderate tiles, two chunks.
    return 6 * 1024 * 1024, 48 * 1024 * 1024, 2


def _hinge_colmax_kernel(x_ref, tgt_ref, colmax_ref):
    i = pl.program_id(1)

    @pl.when(i == 0)
    def _():
        colmax_ref[...] = jnp.full(colmax_ref.shape, _NEG, dtype=colmax_ref.dtype)

    x_nat = x_ref[...]                              # (tn, V), native dtype
    tgt = tgt_ref[...]                              # (tn, 1) int32
    rows, v = x_nat.shape

    # Gather x[n, target[n]] via one-hot select + lane-sum (XLU slot, overlaps
    # the VPU work).  Iota is only (1, V); select/sum stay in the input dtype
    # (exact: a single nonzero per row), upcast once for the subtract.
    lane = jax.lax.broadcasted_iota(jnp.int32, (1, v), 1)
    sel = jnp.where(lane == tgt, x_nat, jnp.zeros((), x_nat.dtype))
    correct = jnp.sum(sel, axis=-1, keepdims=True).astype(jnp.float32)   # (tn,1)

    # '+1' hoisted to the wrapper epilogue.
    margins = x_nat.astype(jnp.float32) - correct   # (tn, V)

    # Fold rows onto 8 sublanes with a pure-VPU max; cross-sublane/cross-chunk
    # max and the scalar finalize happen in the JAX wrapper.
    folded = jnp.max(margins.reshape(rows // 8, 8, v), axis=0)           # (8, V)
    colmax_ref[...] = jnp.maximum(colmax_ref[...], folded[None])


def hinge_model_criterion(inp, target, mask, *, tile_bytes=None,
                          vmem_limit_bytes=None, num_chunks=None,
                          max_tile_rows=4096):
    """inp: (B, T, V) float; target: (B, T) int; mask: (B, T) -> scalar loss."""
    B, T, V = inp.shape
    N = B * T
    x = inp.reshape(N, V)                            # keep native dtype (bf16 ok)
    tgt = target.reshape(N).astype(jnp.int32)
    msum = jnp.sum(mask.astype(jnp.float32))

    auto_tb, auto_vl, auto_nc = _auto_config()
    tile_bytes = auto_tb if tile_bytes is None else tile_bytes
    vmem_limit_bytes = auto_vl if vmem_limit_bytes is None else vmem_limit_bytes
    num_chunks = auto_nc if num_chunks is None else num_chunks

    def finalize(colmax):
        # sum_v max_n(x+1-correct) - 1  ==  sum_v max_n(x-correct) + V - 1
        # NOTE: like the original torch module, no guard for sum(mask) == 0.
        return (jnp.sum(colmax) + (float(V) - 1.0)) / msum

    if N < 8:
        # Degenerate tiny case: pure JAX (no useful tile exists).
        xf = x.astype(jnp.float32)
        c = jnp.take_along_axis(xf, tgt[:, None], axis=1)
        return finalize(jnp.max(xf - c, axis=0))

    itemsize = jnp.dtype(inp.dtype).itemsize
    lane_w = _round_up(V, 128)                       # VMEM lane footprint
    tn = tile_bytes // (lane_w * itemsize)
    tn = max(8, min(max_tile_rows, (tn // 8) * 8))
    tn = min(tn, (N // 8) * 8)

    total_tiles = N // tn                            # full, in-bounds tiles
    nchunks = max(1, min(num_chunks, total_tiles))
    tiles_per_chunk = total_tiles // nchunks
    n_main = nchunks * tiles_per_chunk * tn          # rows handled by the kernel

    part = pl.pallas_call(
        _hinge_colmax_kernel,
        out_shape=jax.ShapeDtypeStruct((nchunks, 8, V), jnp.float32),
        grid_spec=pltpu.PrefetchScalarGridSpec(
            num_scalar_prefetch=0,
            grid=(nchunks, tiles_per_chunk),
            in_specs=[
                pl.BlockSpec((tn, V), lambda c, i: (c * tiles_per_chunk + i, 0)),
                pl.BlockSpec((tn, 1), lambda c, i: (c * tiles_per_chunk + i, 0)),
            ],
            out_specs=pl.BlockSpec((1, 8, V), lambda c, i: (c, 0, 0)),
        ),
        compiler_params=pltpu.CompilerParams(
            dimension_semantics=("parallel", "arbitrary"),
            vmem_limit_bytes=vmem_limit_bytes,
        ),
    )(x, tgt.reshape(N, 1))

    # Epilogue in JAX: max over chunks + sublanes.
    colmax = jnp.max(part, axis=(0, 1))              # (V,)

    if n_main < N:
        # Ragged tail (< num_chunks * tn rows) folded in plain JAX; avoids both
        # a padded HBM copy of x and any OOB reads / in-kernel row masking.
        xt = x[n_main:].astype(jnp.float32)
        ct = jnp.take_along_axis(xt, tgt[n_main:, None], axis=1)
        colmax = jnp.maximum(colmax, jnp.max(xt - ct, axis=0))

    return finalize(colmax)


def hinge_ref(inp, target, mask):
    B, T, V = inp.shape
    N = B * T
    x = inp.reshape(N, V).astype(jnp.float32)
    t = target.reshape(N).astype(jnp.int32)
    correct = x[jnp.arange(N), t][:, None]
    margins = x + 1.0 - correct
    return (jnp.sum(jnp.max(margins, axis=0)) - 1.0) / jnp.sum(
        mask.astype(jnp.float32))


if __name__ == "__main__":
    key = jax.random.PRNGKey(0)
    k1, k2, k3, k4, k5, k6, k7, k8, k9 = jax.random.split(key, 9)

    # Case 1: V not a multiple of 128 (full-V lane block), N a multiple of 8.
    B, T, V = 2, 8, 32
    inp = jax.random.normal(k1, (B, T, V), dtype=jnp.float32)
    target = jax.random.randint(k2, (B, T), 0, V, dtype=jnp.int32)
    mask = (jax.random.uniform(k3, (B, T)) < 0.8).astype(jnp.float32)
    mask = mask.at[:, 0].set(1.0)  # ensure sum(mask) > 0
    loss = hinge_model_criterion(inp, target, mask)
    jax.block_until_ready(loss)
    ref = hinge_ref(inp, target, mask)
    assert jnp.allclose(loss, ref, rtol=1e-5, atol=1e-5), (loss, ref)

    # Case 2: ragged row count (exercises the wrapper-side tail fold).
    B2, T2, V2 = 3, 5, 160
    inp2 = jax.random.normal(k4, (B2, T2, V2), dtype=jnp.float32)
    target2 = jax.random.randint(k5, (B2, T2), 0, V2, dtype=jnp.int32)
    mask2 = (jax.random.uniform(k6, (B2, T2)) < 0.8).astype(jnp.float32)
    mask2 = mask2.at[:, 0].set(1.0)
    loss2 = hinge_model_criterion(inp2, target2, mask2)
    jax.block_until_ready(loss2)
    ref2 = hinge_ref(inp2, target2, mask2)
    assert jnp.allclose(loss2, ref2, rtol=1e-5, atol=1e-5), (loss2, ref2)

    # Case 3: forced multi-tile, 2 chunks + tail (exercises the accumulator
    # across the reduction axis and per-chunk partial maxima).
    B3, T3, V3 = 9, 8, 256
    inp3 = jax.random.normal(k7, (B3, T3, V3), dtype=jnp.float32)
    target3 = jax.random.randint(k8, (B3, T3), 0, V3, dtype=jnp.int32)
    mask3 = (jax.random.uniform(k9, (B3, T3)) < 0.8).astype(jnp.float32)
    mask3 = mask3.at[:, 0].set(1.0)
    loss3 = hinge_model_criterion(inp3, target3, mask3,
                                  tile_bytes=8 * 256 * 4, num_chunks=2)
    jax.block_until_ready(loss3)
    ref3 = hinge_ref(inp3, target3, mask3)
    assert jnp.allclose(loss3, ref3, rtol=1e-5, atol=1e-5), (loss3, ref3)

    print("KERNEL_OK")
</pallas_src>

<mosaic_0001>
module attributes {stable_mosaic.version = 11 : i64} {
  func.func @_hinge_colmax_kernel(%arg0: i32, %arg1: i32, %arg2: memref<16x32xf32, #tpu.memory_space<vmem>>, %arg3: memref<16x1xi32, #tpu.memory_space<vmem>>, %arg4: memref<1x8x32xf32, #tpu.memory_space<vmem>>) attributes {dimension_semantics = [#tpu.dimension_semantics<parallel>, #tpu.dimension_semantics<arbitrary>], iteration_bounds = array<i64: 1, 1>, scalar_prefetch = 0 : i64, scratch_operands = 0 : i64, tpu.core_type = #tpu.core_type<tc>, window_params = [{transform_indices = @transform_0, window_bounds = array<i64: 16, 32>}, {transform_indices = @transform_1, window_bounds = array<i64: 16, 1>}, {transform_indices = @transform_2, window_bounds = array<i64: 1, 8, 32>}]} {
    %c0_i32 = arith.constant 0 : i32
    %0 = arith.cmpi eq, %arg1, %c0_i32 : i32
    %1 = arith.extui %0 : i1 to i32
    %c0_i32_0 = arith.constant 0 : i32
    %2 = arith.cmpi ne, %1, %c0_i32_0 : i32
    scf.if %2 {
      %cst_12 = arith.constant -3.40282347E+38 : f32
      %21 = vector.broadcast %cst_12 : f32 to vector<1x8x32xf32>
      %c0_13 = arith.constant 0 : index
      %c0_14 = arith.constant 0 : index
      %c0_15 = arith.constant 0 : index
      %22 = vector.load %arg4[%c0_13, %c0_14, %c0_15] : memref<1x8x32xf32, #tpu.memory_space<vmem>>, vector<1x8x32xf32>
      tpu.vector_store %arg4[%c0_13, %c0_14, %c0_15], %21 {strides = array<i32>} : memref<1x8x32xf32, #tpu.memory_space<vmem>>, vector<1x8x32xf32>,
    } else {
    }
    %c0 = arith.constant 0 : index
    %c0_1 = arith.constant 0 : index
    %3 = vector.load %arg2[%c0, %c0_1] : memref<16x32xf32, #tpu.memory_space<vmem>>, vector<16x32xf32>
    %c0_2 = arith.constant 0 : index
    %c0_3 = arith.constant 0 : index
    %4 = vector.load %arg3[%c0_2, %c0_3] : memref<16x1xi32, #tpu.memory_space<vmem>>, vector<16x1xi32>
    %5 = tpu.iota {dimensions = array<i32: 1>} : vector<1x32xi32>
    %6 = vector.broadcast %5 : vector<1x32xi32> to vector<16x32xi32>
    %7 = vector.broadcast %4 : vector<16x1xi32> to vector<16x32xi32>
    %8 = arith.cmpi eq, %6, %7 : vector<16x32xi32>
    %cst = arith.constant 0.000000e+00 : f32
    %9 = vector.broadcast %cst : f32 to vector<16x32xf32>
    %10 = arith.select %8, %3, %9 : vector<16x32xi1>, vector<16x32xf32>
    %cst_4 = arith.constant dense<0.000000e+00> : vector<16xf32>
    %11 = vector.multi_reduction <add>, %10, %cst_4 [1] : vector<16x32xf32> to vector<16xf32>
    %12 = vector.shape_cast %11 : vector<16xf32> to vector<16x1xf32>
    %13 = vector.broadcast %12 : vector<16x1xf32> to vector<16x32xf32>
    %14 = arith.subf %3, %13 : vector<16x32xf32>
    %15 = vector.shape_cast %14 : vector<16x32xf32> to vector<2x8x32xf32>
    %cst_5 = arith.constant dense<0xFF800000> : vector<8x32xf32>
    %16 = vector.multi_reduction <maximumf>, %15, %cst_5 [0] : vector<2x8x32xf32> to vector<8x32xf32>
    %c0_6 = arith.constant 0 : index
    %c0_7 = arith.constant 0 : index
    %c0_8 = arith.constant 0 : index
    %17 = vector.load %arg4[%c0_6, %c0_7, %c0_8] : memref<1x8x32xf32, #tpu.memory_space<vmem>>, vector<1x8x32xf32>
    %18 = vector.shape_cast %16 : vector<8x32xf32> to vector<1x8x32xf32>
    %19 = arith.maximumf %17, %18 : vector<1x8x32xf32>
    %c0_9 = arith.constant 0 : index
    %c0_10 = arith.constant 0 : index
    %c0_11 = arith.constant 0 : index
    %20 = vector.load %arg4[%c0_9, %c0_10, %c0_11] : memref<1x8x32xf32, #tpu.memory_space<vmem>>, vector<1x8x32xf32>
    tpu.vector_store %arg4[%c0_9, %c0_10, %c0_11], %19 {strides = array<i32>} : memref<1x8x32xf32, #tpu.memory_space<vmem>>, vector<1x8x32xf32>,
    return
  }
  func.func @transform_0(%arg0: i32, %arg1: i32) -> (i32, i32) {
    %c1_i32 = arith.constant 1 : i32
    %0 = arith.muli %arg0, %c1_i32 : i32
    %1 = arith.addi %0, %arg1 : i32
    %c0_i32 = arith.constant 0 : i32
    %c0_i32_0 = arith.constant 0 : i32
    return %1, %c0_i32 : i32, i32
  }
  func.func @transform_1(%arg0: i32, %arg1: i32) -> (i32, i32) {
    %c1_i32 = arith.constant 1 : i32
    %0 = arith.muli %arg0, %c1_i32 : i32
    %1 = arith.addi %0, %arg1 : i32
    %c0_i32 = arith.constant 0 : i32
    %c0_i32_0 = arith.constant 0 : i32
    return %1, %c0_i32 : i32, i32
  }
  func.func @transform_2(%arg0: i32, %arg1: i32) -> (i32, i32, i32) {
    %c0_i32 = arith.constant 0 : i32
    %c0_i32_0 = arith.constant 0 : i32
    %c0_i32_1 = arith.constant 0 : i32
    return %arg0, %c0_i32, %c0_i32_0 : i32, i32, i32
  }
}

</mosaic_0001>

<bundles_post_ra>
// kernel: tpu_custom_call.1
= control target key start
LH: loop header
LB: loop body
LE: loop exit
PB: predicated region body
PF: predicated region fallthrough
CT: control target
= control target key end

     0   :  { %v145_v1 = vmov 0   ;;  %s184_s0 = inlined_call_operand.vmem [shape: f32[16,32], index: 0, kind: input, shape index: {}]   ;;  %s185_s1 = inlined_call_operand.vmem [shape: s32[16,1], index: 1, kind: input, shape index: {}]   ;;  %s186_s2 = inlined_call_operand.hbm [shape: f32[1,8,32], index: 2, kind: output, shape index: {}]  }
   0x1   :  { %v64_v0 = vld [vmem:[%s185_s1] sm:$0xff]  ;;  %122 = vset.pattern.permute.xlu0 %v145_v1 }
   0x2   :  { %7 = vsyncpa [#allocation3], 0  ;;  %69 = vperm.xlu0 %122, %v64_v0   ;;  %v65_v2 = vld [vmem:[%s185_s1 + $0x8] sm:$0xff]  ;;  %v66_v3 = vlaneseq  ;;  %v62_v5 = vld [vmem:[%s184_s0] sm:$0xff]  ;;  %vm60_vm0 = vcmask 261120  }
   0x3   :  { %v63_v9 = vld [vmem:[%s184_s0 + $0x8] sm:$0xff]  ;;  %v146_v13 = vmov -3.4028235e+38   ;;  %s147_s0 = smov [#allocation2]  }
   0x4   :  { %v67_v4 = vand.u32 127, %v66_v3  ;;  %61 = vst.msk [vmem:[#allocation2] sm:$0xff] %vm60_vm0, %v146_v13  ;;  %s99_s1 = sshll.u32 %s147_s0, 4  ;;  %s100_s1 = int_to_ptr.vmem [resolvable:$true] %s99_s1 }
   0x5   :  { %s123_s17 = scalar_lea.vmem %s100_s1, 128  ;;  %p128_p1 = scmp.lt.s32.totalorder %s100_s1, %s100_s1 }
   0x6   :  { %72 = vperm.xlu0 %122, %v65_v2   ;;  %p124_p0 = scmp.ne.s32.totalorder %s100_s1, %s123_s17  ;;  %p129_p2 = scmp.lt.s32.totalorder %s123_s17, %s123_s17 }
   0x8   :  { %p130_p3 = por %p129_p2, %p128_p1 }
   0xa   :  { %p131_p4 = pnand %p130_p3, %p124_p0 }
   0xb   :  { %v90_v20 = vld [vmem:[#allocation2] sm:$0xff] }
  0x7d   :  { %v70_v6 = vpop.permute.xlu0 %69 }
  0x7e   :  { %vm74_vm1 = vcmp.eq.s32.totalorder %v67_v4, %v70_v6 }
  0x7f   :  { %v76_v7 = vsel %vm74_vm1, %v62_v5, 0.0 }
  0x80   :  { %v79_v8 = vsel %vm60_vm0, %v76_v7, 0.0 }
  0x81   :  { %v73_v10 = vpop.permute.xlu0 %72  ;;  %80 = vadd.xlane.f32.xlu1 %v79_v8 }
  0x82   :  { %vm75_vm2 = vcmp.eq.s32.totalorder %v67_v4, %v73_v10 }
  0x83   :  { %v77_v11 = vsel %vm75_vm2, %v63_v9, 0.0 }
  0x84   :  { %v82_v12 = vsel %vm60_vm0, %v77_v11, 0.0 }
  0x85   :  { %83 = vadd.xlane.f32.xlu1 %v82_v12 }
 0x10a   :  { %v81_v14 = vpop.xlane.xlu1 %80 }
 0x10b   :  { %v85_v15 = vsub.f32 %v62_v5, %v81_v14 }
 0x10d   :  { %v87_v18 = vsel %vm60_vm0, %v85_v15, -inf }
 0x10e   :  { %v84_v16 = vpop.xlane.xlu1 %83 }
 0x10f   :  { %v86_v17 = vsub.f32 %v63_v9, %v84_v16 }
 0x111   :  { %v88_v19 = vsel %vm60_vm0, %v86_v17, -inf }
 0x112   :  { %v89_v21 = vmax.f32 %v87_v18, %v88_v19 }
 0x114   :  { %v91_v22 = vmax.f32 %v90_v20, %v89_v21 }
 0x116   :  { %92 = vst.msk [vmem:[#allocation2] sm:$0xff] %vm60_vm0, %v91_v22 }
 0x117   :  { %134 = shalt.err (!%p131_p4)
}
 0x118   :  { %102 = dma.vmem_to_hbm [thread:$0]  %s100_s1, 128, %s186_s2, [#allocation3]  }
 0x119   :  { %143 = dma.done.wait [#allocation3], 128  }
 0x11a   :  { %144 = vsyncadd [#allocation3], 4294967168 }
 0x11b   :  { %106 = vsyncpa [#allocation3], 1 }

</bundles_post_ra>
